<compile_context>
chip_gen: v5e
topology: v5e:2x2
jax: 0.10.0
libtpu: 0.0.40
codegen_flags: <defaults>
</compile_context>

<pallas_src>
import functools

import numpy as np
import jax
import jax.numpy as jnp
from jax import lax
from jax.experimental import pallas as pl
from jax.experimental.pallas import tpu as pltpu


def _affine_kernel(coef_ref, x_ref, o_ref):
    # coef_ref: SMEM f32[2] = [scale, shift].  Pure fused multiply-add per
    # vreg -- 1 vld + 2 VALU + 1 vst; HBM-bound on every TPU generation.
    o_ref[...] = x_ref[...] * coef_ref[0] + coef_ref[1]


def _choose_tile_rows(rows, *, target_steps=8, max_rows=2048, min_rows=8):
    """Tile rows: multiple of 8, <= max_rows (1 MiB f32 per tile), sized so the
    grid has ~target_steps steps.  Guarantees >= 2 steps whenever rows >= 16,
    which restores DMA/compute overlap and lets v7x use both TensorCores."""
    tm = rows // target_steps
    tm = max(min_rows, min(max_rows, tm))
    tm = max(min_rows, (tm // 8) * 8)
    return tm


def _stream_affine(x2d, coef):
    rows = x2d.shape[0]
    tm = _choose_tile_rows(rows)
    grid = (pl.cdiv(rows, tm),)  # ragged last block handled by Pallas
    return pl.pallas_call(
        _affine_kernel,
        out_shape=jax.ShapeDtypeStruct(x2d.shape, x2d.dtype),
        grid=grid,
        in_specs=[
            pl.BlockSpec(memory_space=pltpu.MemorySpace.SMEM),  # [scale, shift]
            pl.BlockSpec((tm, 128), lambda i: (i, 0)),          # x tile
        ],
        out_specs=pl.BlockSpec((tm, 128), lambda i: (i, 0)),
        # Real in-place update because x is donated at the jit boundary.
        input_output_aliases={1: 0},
        compiler_params=pltpu.CompilerParams(
            dimension_semantics=("parallel",)),
    )(coef, x2d)


@functools.partial(jax.jit,
                   static_argnames=("p", "scale", "shift"),
                   donate_argnums=(0,))
def random_apply(x_nchw, key, *, p, scale, shift):
    """RandomApply(fn, p).forward(x) with fn(x) = x*scale + shift.

    PyTorch does `if random.random() > p: return x; return fn(x)`, i.e. fn is
    applied with probability p.  We draw u~U[0,1) and apply when u <= p; this
    differs from the strict comparison only on a measure-zero event.
    """
    orig_shape = x_nchw.shape
    total = int(np.prod(orig_shape))
    assert total % (8 * 128) == 0, "flattened size must be a multiple of 8*128"
    rows = total // 128
    x2d = x_nchw.reshape(rows, 128)  # lane-dense slab; bitcast under jit

    u = jax.random.uniform(key, (), dtype=jnp.float32)
    apply_fn = u <= jnp.float32(p)

    coef = jnp.array([scale, shift], dtype=jnp.float32)

    # Gate-off path short-circuits: no HBM read/write of the tensor at all.
    out2d = lax.cond(apply_fn,
                     lambda xx: _stream_affine(xx, coef),
                     lambda xx: xx,
                     x2d)
    return out2d.reshape(orig_shape)


if __name__ == "__main__":
    P, SCALE, SHIFT = 0.7, 1.5, 0.25

    key = jax.random.PRNGKey(0)
    key_x, key_gate = jax.random.split(key)
    x = jax.random.normal(key_x, (2, 4, 16, 16), dtype=jnp.float32)  # NCHW

    # Snapshot input before the call (x's buffer is donated to the jit call).
    x_np = np.asarray(x)

    out = random_apply(x, key_gate, p=P, scale=SCALE, shift=SHIFT)
    out = jax.block_until_ready(out)

    # Correctness: output must be exactly x (gate off) or fn(x) (gate on).
    out_np = np.asarray(out)
    fn_np = x_np * SCALE + SHIFT
    assert out_np.shape == x_np.shape and out_np.dtype == x_np.dtype
    is_identity = np.allclose(out_np, x_np, atol=1e-6)
    is_fn = np.allclose(out_np, fn_np, atol=1e-6)
    assert is_identity or is_fn, "output is neither x nor fn(x)"

    print("KERNEL_OK")
</pallas_src>

<mosaic_0001>
module attributes {stable_mosaic.version = 11 : i64} {
  func.func @_affine_kernel(%arg0: i32, %arg1: memref<2xf32, #tpu.memory_space<smem>>, %arg2: memref<8x128xf32, #tpu.memory_space<vmem>>, %arg3: memref<8x128xf32, #tpu.memory_space<vmem>>) attributes {dimension_semantics = [#tpu.dimension_semantics<parallel>], iteration_bounds = array<i64: 2>, scalar_prefetch = 0 : i64, scratch_operands = 0 : i64, tpu.core_type = #tpu.core_type<tc>, window_params = [{transform_indices = @transform_0, window_bounds = array<i64: 2>}, {transform_indices = @transform_1, window_bounds = array<i64: 8, 128>}, {transform_indices = @transform_2, window_bounds = array<i64: 8, 128>}]} {
    %c0 = arith.constant 0 : index
    %c0_0 = arith.constant 0 : index
    %0 = vector.load %arg2[%c0, %c0_0] : memref<8x128xf32, #tpu.memory_space<vmem>>, vector<8x128xf32>
    %c0_1 = arith.constant 0 : index
    %1 = memref.load %arg1[%c0_1] : memref<2xf32, #tpu.memory_space<smem>>
    %2 = vector.broadcast %1 : f32 to vector<8x128xf32>
    %3 = arith.mulf %0, %2 : vector<8x128xf32>
    %c1 = arith.constant 1 : index
    %4 = memref.load %arg1[%c1] : memref<2xf32, #tpu.memory_space<smem>>
    %5 = vector.broadcast %4 : f32 to vector<8x128xf32>
    %6 = arith.addf %3, %5 : vector<8x128xf32>
    %c0_2 = arith.constant 0 : index
    %c0_3 = arith.constant 0 : index
    %7 = vector.load %arg3[%c0_2, %c0_3] : memref<8x128xf32, #tpu.memory_space<vmem>>, vector<8x128xf32>
    tpu.vector_store %arg3[%c0_2, %c0_3], %6 {strides = array<i32>} : memref<8x128xf32, #tpu.memory_space<vmem>>, vector<8x128xf32>,
    return
  }
  func.func @transform_0(%arg0: i32) -> i32 {
    %c0_i32 = arith.constant 0 : i32
    %c0_i32_0 = arith.constant 0 : i32
    return %c0_i32 : i32
  }
  func.func @transform_1(%arg0: i32) -> (i32, i32) {
    %c0_i32 = arith.constant 0 : i32
    %c0_i32_0 = arith.constant 0 : i32
    return %arg0, %c0_i32 : i32, i32
  }
  func.func @transform_2(%arg0: i32) -> (i32, i32) {
    %c0_i32 = arith.constant 0 : i32
    %c0_i32_0 = arith.constant 0 : i32
    return %arg0, %c0_i32 : i32, i32
  }
}

</mosaic_0001>

<bundles_post_ra>
// kernel: branch_1_fun.1
= control target key start
LH: loop header
LB: loop body
LE: loop exit
PB: predicated region body
PF: predicated region fallthrough
CT: control target
= control target key end

     0   :  { %7 = vsyncpa [#allocation3], 0  ;;  %s300_s9 = smov 0   ;;  %s320_s0 = inlined_call_operand.vmem [shape: f32[2], index: 0, kind: input, shape index: {}]   ;;  %s321_s1 = inlined_call_operand.vmem [shape: f32[16,128], index: 1, kind: input, shape index: {}, may-alias: {1,2}]   ;;  %s322_s2 = inlined_call_operand.vmem [shape: f32[16,128], index: 2, kind: output, shape index: {}, may-alias: {1,2}]  }
   0x1 LB: > { %s226_s10 = sadd.s32 4294967295, %s282_s9   ;;  %p228_p0 = scmp.ge.s32.totalorder %s282_s9, 1  ;;  %s282_s9 = sphi %s300_s9, %s13_s9  }
   0x2   : > { %p91_p1 = scmp.lt.s32.totalorder %s282_s9, 3  ;;  %s103_s13 = sshll.u32 %s320_s0, 4  ;;  %s104_s13 = int_to_ptr.vmem [resolvable:$true] %s103_s13 }
   0x3   : > { %p246_p3 = scmp.eq.s32.totalorder %s226_s10, 0  ;;  %s284_s14 = smov [#allocation2]  }
   0x4   : > { %p92_p2 = pnand %p228_p0, %p91_p1 }
   0x6   : > { %p242_p4 = pneg %p92_p2  ;;  %123 = sbr.rel (%p92_p2) target bundleno = 26 (0x1a), region = 28 }
   0x8   : > { %p243_p5 = pnand %p246_p3, %p242_p4 }
   0xa   : > { %245 = dma.vmem_to_smem (!%p243_p5), %s104_s13, 16, %s284_s14, [#allocation3]  }
   0xb   : > { %277 = dma.done.wait (%p246_p3), [#allocation3], 16  }
   0xc   : > { %279 = vsyncadd (%p246_p3), [#allocation3], 4294967280 }
   0xd   : > { %130 = sfence }
   0xe   : > { %p145_p6 = scmp.lt.s32.totalorder %s226_s10, 1  ;;  %s154_s15 = sld [smem:[#allocation2]] }
   0xf   : > { %s235_s16 = sld [smem:[#allocation2 + $0x1]] }
  0x10   : > { %s324_s10 = smov (!%p145_p6, %s226_s10), 1 }
  0x11   : > { %s233_s17 = sshll.u32 %s324_s10, 3 }
  0x12   : > { %s148_s20 = scalar_lea.vmem %s321_s1, %s233_s17  ;;  %s152_s23 = scalar_lea.vmem %s322_s2, %s233_s17 }
  0x13   : > { %v153_v0 = vld [vmem:[%s148_s20] sm:$0xff] }
  0x14   : > { %v155_v1 = vstv %s154_s15 }
  0x15   : > { %v156_v2 = vmul.f32 %v155_v1, %v153_v0  ;;  %v158_v3 = vstv %s235_s16 }
  0x17   : > { %v159_v4 = vadd.f32 %v158_v3, %v156_v2 }
  0x19   : > { %160 = vst [vmem:[%s152_s23] sm:$0xff] %v159_v4 }
  0x1a PF: > { %s13_s9 = sadd.s32 1, %s282_s9  }
  0x1b   : > { %p10_p7 = scmp.ge.s32.totalorder %s13_s9, 4  }
  0x1d   :  { %12 = sbr.rel (!%p10_p7) target bundleno = 1 (0x1), region = 63 }
  0x22   :  { %180 = vsyncpa [#allocation3], 1 }
  0x23   :  { %182 = vsyncpa [#allocation3 + $0x1], 1 }

</bundles_post_ra>
